<compile_context>
chip_gen: v6e
topology: v6e:2x2x1
jax: 0.10.0
libtpu: 0.0.40
codegen_flags: <defaults>
</compile_context>

<pallas_src>
import math
import functools

import jax
import jax.numpy as jnp
from jax import lax
from jax.experimental import pallas as pl
from jax.experimental.pallas import tpu as pltpu

_NEG_BIG = -1e30  # additive key-padding bias; exp() underflows to exactly 0.0
# Note: fully-padded sequences get a uniform softmax over padded keys instead of
# the NaN the PyTorch -inf mask would produce (divergence only in that case).


def _attn_pool_kernel(x_ref, mask_ref, wq_ref, wk_ref, wv_ref, wo_ref, o_ref,
                      *, num_heads, inv_scale):
    TB, S, E = x_ref.shape
    hd = E // num_heads

    # ---- Q/K/V projections on the flattened (TB*S, E) block (fills MXU rows).
    # Weights are PyTorch (out, in); contract x dim 1 with weight dim 1 == x @ W^T.
    x2 = x_ref[...].reshape(TB * S, E)
    cdims = (((1,), (1,)), ((), ()))
    q = lax.dot_general(x2, wq_ref[...], cdims, preferred_element_type=jnp.float32)
    k = lax.dot_general(x2, wk_ref[...], cdims, preferred_element_type=jnp.float32)
    v = lax.dot_general(x2, wv_ref[...], cdims, preferred_element_type=jnp.float32)

    q = q * jnp.float32(inv_scale)            # fold 1/sqrt(head_dim) into Q once
    q = q.reshape(TB, S, E)
    k = k.reshape(TB, S, E)
    v = v.reshape(TB, S, E)

    # Key-padding additive bias, broadcast over query rows: (TB, 1, S).
    key_bias = mask_ref[...] * jnp.float32(_NEG_BIG)

    inv_s = jnp.float32(1.0 / S)
    head_pooled = []
    # TODO(synk): when num_heads > 1 and head_dim % 128 != 0, these lane slices
    # cross (8,128) tile boundaries; pad head_dim (or pre-split weights per
    # head) to make the slices free views.
    for h in range(num_heads):                 # static unroll; num_heads is tiny
        sl = slice(h * hd, (h + 1) * hd)
        qh, kh, vh = q[:, :, sl], k[:, :, sl], v[:, :, sl]

        scores = jnp.einsum("bqd,bkd->bqk", qh, kh,
                            preferred_element_type=jnp.float32) + key_bias
        m = jnp.max(scores, axis=-1, keepdims=True)
        p = jnp.exp(scores - m)                                     # (TB, S, S)
        l = jnp.sum(p, axis=-1, keepdims=True)                      # (TB, S, 1)
        # mean over query rows of the normalized softmax rows -> (TB, S)
        w_bar = jnp.sum(p * pl.reciprocal(l, approx=True), axis=1) * inv_s
        # pooled_h = w_bar @ V_h, done in f32 (S is small; exact VPU math).
        head_pooled.append(jnp.sum(w_bar[:, :, None] * vh, axis=1))  # (TB, hd)

    pooled = head_pooled[0] if num_heads == 1 else jnp.concatenate(head_pooled, -1)

    # ---- single fused output projection: pooled (TB, E) @ Wo^T.
    out = lax.dot_general(pooled, wo_ref[...], cdims,
                          preferred_element_type=jnp.float32)        # (TB, E)
    o_ref[...] = out.reshape(TB, 1, E).astype(o_ref.dtype)


def self_attention_pooling_pallas(x, mask, wq, wk, wv, wo, *, num_heads=1,
                                  batch_block=None):
    """x: (B, S, E); mask: (B, S) bool (True = padding); weights: (E, E) PyTorch (out,in)."""
    B, S, E = x.shape
    assert E % num_heads == 0, "emb_dim must be divisible by num_heads"
    inv_scale = 1.0 / math.sqrt(E // num_heads)

    # Pick the batch block: fill the MXU M dimension (target ~256 rows per step)
    # while keeping >= 2 grid steps whenever B > 1 (v7x has 2 TensorCores that
    # shard the "parallel" axis). tb must divide B exactly.
    if batch_block is None:
        tb = min(B, max(1, -(-256 // S)))          # ceil(256 / S) rows target
        if B > 1:
            tb = min(tb, max(1, B // 2))
        while B % tb:
            tb -= 1
    else:
        tb = int(batch_block)
        assert B % tb == 0, "batch_block must divide batch"
    grid_len = B // tb

    mask_f = mask.astype(jnp.float32).reshape(B, 1, S)

    kernel = functools.partial(_attn_pool_kernel,
                               num_heads=num_heads, inv_scale=inv_scale)

    out3 = pl.pallas_call(
        kernel,
        out_shape=jax.ShapeDtypeStruct((B, 1, E), x.dtype),
        grid_spec=pltpu.PrefetchScalarGridSpec(
            num_scalar_prefetch=0,
            grid=(grid_len,),
            in_specs=[
                pl.BlockSpec((tb, S, E), lambda b: (b, 0, 0)),   # TB sequences/step
                pl.BlockSpec((tb, 1, S), lambda b: (b, 0, 0)),   # key-padding mask
                pl.BlockSpec((E, E), lambda b: (0, 0)),          # Wq (grid-invariant)
                pl.BlockSpec((E, E), lambda b: (0, 0)),          # Wk
                pl.BlockSpec((E, E), lambda b: (0, 0)),          # Wv
                pl.BlockSpec((E, E), lambda b: (0, 0)),          # Wo
            ],
            out_specs=pl.BlockSpec((tb, 1, E), lambda b: (b, 0, 0)),
        ),
        compiler_params=pltpu.CompilerParams(
            dimension_semantics=("parallel",),
            # Raise toward 64-96 MiB on v5e/v6e for large E / larger batch
            # blocks; keep <= ~48 MiB headroom on v7x (64 MiB physical VMEM).
            vmem_limit_bytes=32 * 1024 * 1024,
        ),
    )(x, mask_f, wq, wk, wv, wo)

    return out3.reshape(B, E)


def self_attention_pooling_ref(x, mask, wq, wk, wv, wo, *, num_heads=1):
    """Pure-JAX reference mirroring the PyTorch forward (default matmul precision)."""
    B, S, E = x.shape
    hd = E // num_heads
    scale = math.sqrt(E // num_heads)

    def proj(w):
        y = jnp.einsum("bse,oe->bso", x, w)
        return y.reshape(B, S, num_heads, hd).transpose(0, 2, 1, 3)

    q, k, v = proj(wq), proj(wk), proj(wv)
    scores = jnp.einsum("bhqd,bhkd->bhqk", q, k) / scale
    scores = jnp.where(mask[:, None, None, :], -jnp.inf, scores)
    w = jax.nn.softmax(scores, axis=-1)
    attn = jnp.einsum("bhqk,bhkd->bhqd", w, v)
    attn = attn.transpose(0, 2, 1, 3).reshape(B, S, E)
    pooled = attn.mean(axis=1)
    return jnp.einsum("be,oe->bo", pooled, wo)


if __name__ == "__main__":
    # Small shapes consistent with the module: batch=2, seq=8, emb_dim=32, num_heads=1.
    B, S, E, H = 2, 8, 32, 1

    key = jax.random.PRNGKey(0)
    kx, kq, kk, kv, ko = jax.random.split(key, 5)

    x = jax.random.normal(kx, (B, S, E), dtype=jnp.float32)

    # xavier_normal_ init: std = sqrt(2 / (fan_in + fan_out))
    std = math.sqrt(2.0 / (E + E))
    wq = std * jax.random.normal(kq, (E, E), dtype=jnp.float32)
    wk = std * jax.random.normal(kk, (E, E), dtype=jnp.float32)
    wv = std * jax.random.normal(kv, (E, E), dtype=jnp.float32)
    wo = std * jax.random.normal(ko, (E, E), dtype=jnp.float32)

    # Padding mask: True = pad. Batch 0 has 5 valid tokens, batch 1 is full length.
    lengths = jnp.array([5, 8], dtype=jnp.int32)
    mask = jnp.arange(S, dtype=jnp.int32)[None, :] >= lengths[:, None]

    out = self_attention_pooling_pallas(x, mask, wq, wk, wv, wo, num_heads=H)
    out = jax.block_until_ready(out)

    ref = self_attention_pooling_ref(x, mask, wq, wk, wv, wo, num_heads=H)
    assert out.shape == (B, E)
    # Tolerance is intentionally loose: the kernel uses the default (fast,
    # single-pass) MXU precision per the perf review and the mean-pool identity
    # reorders the reductions, so results are not bit-identical to the reference.
    assert jnp.allclose(out, ref, atol=3e-2, rtol=3e-2), "mismatch vs reference"

    print("KERNEL_OK")
</pallas_src>

<mosaic_0001>
module attributes {stable_mosaic.version = 11 : i64} {
  func.func @_attn_pool_kernel(%arg0: i32, %arg1: memref<1x8x32xf32, #tpu.memory_space<vmem>>, %arg2: memref<1x1x8xf32, #tpu.memory_space<vmem>>, %arg3: memref<32x32xf32, #tpu.memory_space<vmem>>, %arg4: memref<32x32xf32, #tpu.memory_space<vmem>>, %arg5: memref<32x32xf32, #tpu.memory_space<vmem>>, %arg6: memref<32x32xf32, #tpu.memory_space<vmem>>, %arg7: memref<1x1x32xf32, #tpu.memory_space<vmem>>) attributes {dimension_semantics = [#tpu.dimension_semantics<parallel>], iteration_bounds = array<i64: 2>, scalar_prefetch = 0 : i64, scratch_operands = 0 : i64, tpu.core_type = #tpu.core_type<tc>, window_params = [{transform_indices = @transform_0, window_bounds = array<i64: 1, 8, 32>}, {transform_indices = @transform_1, window_bounds = array<i64: 1, 1, 8>}, {pipeline_mode = #tpu.pipeline_mode<synchronous>, transform_indices = @transform_2, window_bounds = array<i64: 32, 32>}, {pipeline_mode = #tpu.pipeline_mode<synchronous>, transform_indices = @transform_3, window_bounds = array<i64: 32, 32>}, {pipeline_mode = #tpu.pipeline_mode<synchronous>, transform_indices = @transform_4, window_bounds = array<i64: 32, 32>}, {pipeline_mode = #tpu.pipeline_mode<synchronous>, transform_indices = @transform_5, window_bounds = array<i64: 32, 32>}, {transform_indices = @transform_6, window_bounds = array<i64: 1, 1, 32>}]} {
    %c0 = arith.constant 0 : index
    %c0_0 = arith.constant 0 : index
    %c0_1 = arith.constant 0 : index
    %0 = vector.load %arg1[%c0, %c0_0, %c0_1] : memref<1x8x32xf32, #tpu.memory_space<vmem>>, vector<1x8x32xf32>
    %1 = vector.shape_cast %0 : vector<1x8x32xf32> to vector<8x32xf32>
    %c0_2 = arith.constant 0 : index
    %c0_3 = arith.constant 0 : index
    %2 = vector.load %arg3[%c0_2, %c0_3] : memref<32x32xf32, #tpu.memory_space<vmem>>, vector<32x32xf32>
    %cst = arith.constant dense<0.000000e+00> : vector<8x32xf32>
    %3 = tpu.matmul %1, %2, %cst {dimension_numbers = #tpu.dot_dimension_numbers<[1], [1], [0], [0], [0, 0, 1, 0], [], []>} : vector<8x32xf32>, vector<32x32xf32>, vector<8x32xf32> -> vector<8x32xf32>
    %c0_4 = arith.constant 0 : index
    %c0_5 = arith.constant 0 : index
    %4 = vector.load %arg4[%c0_4, %c0_5] : memref<32x32xf32, #tpu.memory_space<vmem>>, vector<32x32xf32>
    %cst_6 = arith.constant dense<0.000000e+00> : vector<8x32xf32>
    %5 = tpu.matmul %1, %4, %cst_6 {dimension_numbers = #tpu.dot_dimension_numbers<[1], [1], [0], [0], [0, 0, 1, 0], [], []>} : vector<8x32xf32>, vector<32x32xf32>, vector<8x32xf32> -> vector<8x32xf32>
    %c0_7 = arith.constant 0 : index
    %c0_8 = arith.constant 0 : index
    %6 = vector.load %arg5[%c0_7, %c0_8] : memref<32x32xf32, #tpu.memory_space<vmem>>, vector<32x32xf32>
    %cst_9 = arith.constant dense<0.000000e+00> : vector<8x32xf32>
    %7 = tpu.matmul %1, %6, %cst_9 {dimension_numbers = #tpu.dot_dimension_numbers<[1], [1], [0], [0], [0, 0, 1, 0], [], []>} : vector<8x32xf32>, vector<32x32xf32>, vector<8x32xf32> -> vector<8x32xf32>
    %cst_10 = arith.constant 0.176776692 : f32
    %8 = vector.broadcast %cst_10 : f32 to vector<8x32xf32>
    %9 = arith.mulf %3, %8 : vector<8x32xf32>
    %10 = vector.shape_cast %9 : vector<8x32xf32> to vector<1x8x32xf32>
    %11 = vector.shape_cast %5 : vector<8x32xf32> to vector<1x8x32xf32>
    %12 = vector.shape_cast %7 : vector<8x32xf32> to vector<1x8x32xf32>
    %c0_11 = arith.constant 0 : index
    %c0_12 = arith.constant 0 : index
    %c0_13 = arith.constant 0 : index
    %13 = vector.load %arg2[%c0_11, %c0_12, %c0_13] : memref<1x1x8xf32, #tpu.memory_space<vmem>>, vector<1x1x8xf32>
    %cst_14 = arith.constant -1.000000e+30 : f32
    %14 = vector.broadcast %cst_14 : f32 to vector<1x1x8xf32>
    %15 = arith.mulf %13, %14 : vector<1x1x8xf32>
    "tpu.trace_start"() <{level = 10 : i32, message = "bqd,bkd->bqk"}> : () -> ()
    %cst_15 = arith.constant dense<0.000000e+00> : vector<1x8x8xf32>
    %16 = tpu.matmul %10, %11, %cst_15 {dimension_numbers = #tpu.dot_dimension_numbers<[2], [2], [1], [1], [0, 0, 0, 1, 1, 1], [0], [0]>} : vector<1x8x32xf32>, vector<1x8x32xf32>, vector<1x8x8xf32> -> vector<1x8x8xf32>
    "tpu.trace_stop"() : () -> ()
    %17 = vector.broadcast %15 : vector<1x1x8xf32> to vector<1x8x8xf32>
    %18 = arith.addf %16, %17 : vector<1x8x8xf32>
    %cst_16 = arith.constant dense<0xFF800000> : vector<1x8xf32>
    %19 = vector.multi_reduction <maximumf>, %18, %cst_16 [2] : vector<1x8x8xf32> to vector<1x8xf32>
    %20 = vector.shape_cast %19 : vector<1x8xf32> to vector<1x8x1xf32>
    %21 = vector.broadcast %20 : vector<1x8x1xf32> to vector<1x8x8xf32>
    %22 = arith.subf %18, %21 : vector<1x8x8xf32>
    %23 = math.exp %22 : vector<1x8x8xf32>
    %cst_17 = arith.constant dense<0.000000e+00> : vector<1x8xf32>
    %24 = vector.multi_reduction <add>, %23, %cst_17 [2] : vector<1x8x8xf32> to vector<1x8xf32>
    %25 = vector.shape_cast %24 : vector<1x8xf32> to vector<1x8x1xf32>
    %26 = tpu.reciprocal %25 {approx = true} : vector<1x8x1xf32> -> vector<1x8x1xf32>
    %27 = vector.broadcast %26 : vector<1x8x1xf32> to vector<1x8x8xf32>
    %28 = arith.mulf %23, %27 : vector<1x8x8xf32>
    %cst_18 = arith.constant dense<0.000000e+00> : vector<1x8xf32>
    %29 = vector.multi_reduction <add>, %28, %cst_18 [1] : vector<1x8x8xf32> to vector<1x8xf32>
    %cst_19 = arith.constant 1.250000e-01 : f32
    %30 = vector.broadcast %cst_19 : f32 to vector<1x8xf32>
    %31 = arith.mulf %29, %30 : vector<1x8xf32>
    %32 = vector.shape_cast %31 : vector<1x8xf32> to vector<1x8x1xf32>
    %33 = vector.broadcast %32 : vector<1x8x1xf32> to vector<1x8x32xf32>
    %34 = arith.mulf %33, %12 : vector<1x8x32xf32>
    %cst_20 = arith.constant dense<0.000000e+00> : vector<1x32xf32>
    %35 = vector.multi_reduction <add>, %34, %cst_20 [1] : vector<1x8x32xf32> to vector<1x32xf32>
    %c0_21 = arith.constant 0 : index
    %c0_22 = arith.constant 0 : index
    %36 = vector.load %arg6[%c0_21, %c0_22] : memref<32x32xf32, #tpu.memory_space<vmem>>, vector<32x32xf32>
    %cst_23 = arith.constant dense<0.000000e+00> : vector<1x32xf32>
    %37 = tpu.matmul %35, %36, %cst_23 {dimension_numbers = #tpu.dot_dimension_numbers<[1], [1], [0], [0], [0, 0, 1, 0], [], []>} : vector<1x32xf32>, vector<32x32xf32>, vector<1x32xf32> -> vector<1x32xf32>
    %38 = vector.shape_cast %37 : vector<1x32xf32> to vector<1x1x32xf32>
    %c0_24 = arith.constant 0 : index
    %c0_25 = arith.constant 0 : index
    %c0_26 = arith.constant 0 : index
    %39 = vector.load %arg7[%c0_24, %c0_25, %c0_26] : memref<1x1x32xf32, #tpu.memory_space<vmem>>, vector<1x1x32xf32>
    tpu.vector_store %arg7[%c0_24, %c0_25, %c0_26], %38 {strides = array<i32>} : memref<1x1x32xf32, #tpu.memory_space<vmem>>, vector<1x1x32xf32>,
    return
  }
  func.func @transform_0(%arg0: i32) -> (i32, i32, i32) {
    %c0_i32 = arith.constant 0 : i32
    %c0_i32_0 = arith.constant 0 : i32
    %c0_i32_1 = arith.constant 0 : i32
    return %arg0, %c0_i32, %c0_i32_0 : i32, i32, i32
  }
  func.func @transform_1(%arg0: i32) -> (i32, i32, i32) {
    %c0_i32 = arith.constant 0 : i32
    %c0_i32_0 = arith.constant 0 : i32
    %c0_i32_1 = arith.constant 0 : i32
    return %arg0, %c0_i32, %c0_i32_0 : i32, i32, i32
  }
  func.func @transform_2(%arg0: i32) -> (i32, i32) {
    %c0_i32 = arith.constant 0 : i32
    %c0_i32_0 = arith.constant 0 : i32
    %c0_i32_1 = arith.constant 0 : i32
    return %c0_i32, %c0_i32_0 : i32, i32
  }
  func.func @transform_3(%arg0: i32) -> (i32, i32) {
    %c0_i32 = arith.constant 0 : i32
    %c0_i32_0 = arith.constant 0 : i32
    %c0_i32_1 = arith.constant 0 : i32
    return %c0_i32, %c0_i32_0 : i32, i32
  }
  func.func @transform_4(%arg0: i32) -> (i32, i32) {
    %c0_i32 = arith.constant 0 : i32
    %c0_i32_0 = arith.constant 0 : i32
    %c0_i32_1 = arith.constant 0 : i32
    return %c0_i32, %c0_i32_0 : i32, i32
  }
  func.func @transform_5(%arg0: i32) -> (i32, i32) {
    %c0_i32 = arith.constant 0 : i32
    %c0_i32_0 = arith.constant 0 : i32
    %c0_i32_1 = arith.constant 0 : i32
    return %c0_i32, %c0_i32_0 : i32, i32
  }
  func.func @transform_6(%arg0: i32) -> (i32, i32, i32) {
    %c0_i32 = arith.constant 0 : i32
    %c0_i32_0 = arith.constant 0 : i32
    %c0_i32_1 = arith.constant 0 : i32
    return %arg0, %c0_i32, %c0_i32_0 : i32, i32, i32
  }
}

</mosaic_0001>

<bundles_post_ra>
// kernel: tpu_custom_call.1
= control target key start
LH: loop header
LB: loop body
LE: loop exit
PB: predicated region body
PF: predicated region fallthrough
CT: control target
= control target key end

     0   :  { %s1799_s0 = inlined_call_operand.hbm [shape: f32[2,8,32], index: 0, kind: input, shape index: {}]   ;;  %s1800_s1 = inlined_call_operand.hbm [shape: f32[2,1,8], index: 1, kind: input, shape index: {}]   ;;  %s1801_s2 = inlined_call_operand.hbm [shape: f32[32,32], index: 2, kind: input, shape index: {}]   ;;  %s1802_s3 = inlined_call_operand.hbm [shape: f32[32,32], index: 3, kind: input, shape index: {}]   ;;  %s1803_s4 = inlined_call_operand.hbm [shape: f32[32,32], index: 4, kind: input, shape index: {}]   ;;  %s1804_s5 = inlined_call_operand.hbm [shape: f32[32,32], index: 5, kind: input, shape index: {}]   ;;  %s1805_s6 = inlined_call_operand.hbm [shape: f32[2,1,32], index: 6, kind: output, shape index: {}]  }
   0x1   :  { %1810 = sst [smem:[#allocation20_spill]] %s1799_s0 }
   0x2   :  { %1811 = sst [smem:[#allocation21_spill]] %s1801_s2 }
   0x3   :  { %1812 = sst [smem:[#allocation22_spill]] %s1802_s3 }
   0x4   :  { %11 = vsyncpa [#allocation3], 0 }
   0x5   :  { %13 = vsyncpa [#allocation3 + $0x1], 0 }
   0x6   :  { %14 = vsyncpa [#allocation6], 0 }
   0x7   :  { %16 = vsyncpa [#allocation6 + $0x1], 0 }
   0x8   :  { %17 = vsyncpa [#allocation9], 0 }
   0x9   :  { %18 = vsyncpa [#allocation12], 0 }
   0xa   :  { %19 = vsyncpa [#allocation4], 0 }
   0xb   :  { %21 = vsyncpa [#allocation4 + $0x1], 0  ;;  %s1465_s21 = smov 0   ;;  %s1467_s22 = smov 0  }
   0xc   :  { %s1469_s23 = smov 0   ;;  %s1471_s24 = smov 0  }
   0xd LB: > { %s1419_s25 = smov [#allocation7]   ;;  %s1486_s27 = sadd.s32 4294967295, %s1417_s24   ;;  %s1417_s24 = sphi %s1471_s24, %s1838_s24   ;;  %s1413_s23 = sphi %s1469_s23, %s1837_s23   ;;  %s1409_s22 = sphi %s1467_s22, %s1836_s22   ;;  %s1405_s21 = sphi %s1465_s21, %s1835_s21  }
   0xe   : > { %s206_s26 = sshll.u32 %s1419_s25, 4  ;;  %p966_p0 = scmp.ge.s32.totalorder %s1417_s24, 1  ;;  %s207_s26 = int_to_ptr.vmem [resolvable:$true] %s206_s26 }
   0xf   : > { %p1806_p1 = scmp.eq.s32.totalorder %s1486_s27, 0  ;;  %p194_p2 = scmp.lt.s32.totalorder %s1417_s24, 3 }
  0x10   : > { %s1420_s29 = smov [#allocation8]   ;;  %s1421_s8 = smov [#allocation10]  }
  0x11   : > { %p1491_p3 = pnand %p966_p0, %p194_p2  ;;  %s219_s30 = sshll.u32 %s1420_s29, 4  ;;  %s1504_s30 = int_to_ptr.vmem [resolvable:$true] %s219_s30 }
  0x12   : > { %s232_s9 = sshll.u32 %s1421_s8, 4  ;;  %s1188_s10 = scalar_lea.vmem %s207_s26, 512  ;;  %s1506_s9 = int_to_ptr.vmem [resolvable:$true] %s232_s9 }
  0x13   : > { %s1813_s28 = scalar_select %p1491_p3, 1, 0 }
  0x14   : > { %p1099_p5 = pneg %p1491_p3  ;;  %p1189_p8 = scmp.ne.s32.totalorder %s207_s26, %s1188_s10 }
  0x15   : > { %p1196_p11 = scmp.lt.s32.totalorder %s207_s26, %s207_s26  ;;  %p1197_p12 = scmp.lt.s32.totalorder %s1188_s10, %s1188_s10 }
  0x16   : > { %p1500_p6 = pnand %p1099_p5, %p1806_p1 }
  0x17   : > { %p1198_p13 = por %p1197_p12, %p1196_p11 }
  0x18   : > { %p1179_p7 = pneg %p1500_p6 }
  0x1a   : > { %p1191_p9 = pnand %p1189_p8, %p1179_p7 }
  0x1c   : > { %p1192_p10 = pneg %p1191_p9 }
  0x1e   : > { %p1199_p0 = pnand %p1198_p13, %p1192_p10 }
  0x20   : > { %1202 = shalt.err (!%p1199_p0)
}
  0x21   : > { %s1422_s11 = smov 128   ;;  %s1423_s12 = smov 8  }
  0x22   : > { %s1815_s2 = sld [smem:[#allocation21_spill]]  ;;  %s1214_s15 = scalar_lea.vmem %s1504_s30, 512 }
  0x23   : > { %p1215_p2 = scmp.ne.s32.totalorder %s1504_s30, %s1214_s15  ;;  %p1222_p9 = scmp.lt.s32.totalorder %s1504_s30, %s1504_s30 }
  0x24   : > { %p1223_p10 = scmp.lt.s32.totalorder %s1214_s15, %s1214_s15 }
  0x25   : > { %p1217_p5 = pnand %p1215_p2, %p1179_p7 }
  0x26   : > { %p1224_p11 = por %p1223_p10, %p1222_p9 }
  0x27   : > { %p1218_p8 = pneg %p1217_p5 }
  0x28   : > { %1102 = dma.hbm_to_vmem [thread:$0]  (!%p1500_p6), %s1815_s2, 512, %s207_s26, [#allocation6], %s1422_s11, %s1422_s11, %s1423_s12  }
  0x29   : > { %p1225_p12 = pnand %p1224_p11, %p1218_p8 }
  0x2b   : > { %1228 = shalt.err (!%p1225_p12)
}
  0x2c   : > { %s1816_s3 = sld [smem:[#allocation22_spill]]  ;;  %s1240_s18 = scalar_lea.vmem %s1506_s9, 512 }
  0x2d   : > { %p1241_p13 = scmp.ne.s32.totalorder %s1506_s9, %s1240_s18  ;;  %p1248_p5 = scmp.lt.s32.totalorder %s1506_s9, %s1506_s9 }
  0x2e   : > { %p1249_p8 = scmp.lt.s32.totalorder %s1240_s18, %s1240_s18 }
  0x2f   : > { %p1243_p0 = pnand %p1241_p13, %p1179_p7 }
  0x30   : > { %p1250_p9 = por %p1249_p8, %p1248_p5 }
  0x31   : > { %p1244_p2 = pneg %p1243_p0 }
  0x32   : > { %1105 = dma.hbm_to_vmem [thread:$0]  (!%p1500_p6), %s1816_s3, 512, %s1504_s30, [#allocation9], %s1422_s11, %s1422_s11, %s1423_s12  }
  0x33   : > { %p1251_p10 = pnand %p1250_p9, %p1244_p2 }
  0x35   : > { %1254 = shalt.err (!%p1251_p10)
}
  0x36   : > { %1108 = dma.hbm_to_vmem [thread:$0]  (!%p1500_p6), %s1803_s4, 512, %s1506_s9, [#allocation9], %s1422_s11, %s1422_s11, %s1423_s12  }
  0x37   : > { %s1424_s25 = smov [#allocation11]  }
  0x38   : > { %s245_s26 = sshll.u32 %s1424_s25, 4  ;;  %s246_s26 = int_to_ptr.vmem [resolvable:$true] %s245_s26 }
  0x39   : > { %s1266_s29 = scalar_lea.vmem %s246_s26, 512  ;;  %p1274_p0 = scmp.lt.s32.totalorder %s246_s26, %s246_s26 }
  0x3a   : > { %p1267_p11 = scmp.ne.s32.totalorder %s246_s26, %s1266_s29  ;;  %p1275_p2 = scmp.lt.s32.totalorder %s1266_s29, %s1266_s29 }
  0x3c   : > { %p1269_p12 = pnand %p1267_p11, %p1179_p7  ;;  %p1276_p5 = por %p1275_p2, %p1274_p0 }
  0x3e   : > { %p1270_p13 = pneg %p1269_p12 }
  0x40   : > { %p1277_p8 = pnand %p1276_p5, %p1270_p13 }
  0x42   : > { %1280 = shalt.err (!%p1277_p8)
}
  0x43   : > { %1111 = dma.hbm_to_vmem [thread:$0]  (!%p1500_p6), %s1804_s5, 512, %s246_s26, [#allocation12], %s1422_s11, %s1422_s11, %s1423_s12  }
  0x44   : > { %s965_s7 = sadd.s32 4294967294, %s1417_s24   ;;  %s1566_s9 = sadd.s32 1, %s1417_s24  }
  0x45   : > { %s31_s10 = ssub.s32 %s1417_s24, %s1566_s9  ;;  %s34_s13 = sadd.s32 1, %s1413_s23 }
  0x46   : > { %p32_p7 = scmp.eq.s32.totalorder %s31_s10, 0  ;;  %p41_p9 = scmp.ne.s32.totalorder %s1413_s23, %s1409_s22 }
  0x47   : > { %p42_p10 = scmp.eq.s32.totalorder %s1417_s24, 0  ;;  %p47_p11 = scmp.ne.s32.totalorder %s1409_s22, %s1405_s21 }
  0x48   : > { %s1577_s14 = scalar_select %p32_p7, %s1413_s23, %s34_s13  }
  0x49   : > { %p1579_p12 = por %p42_p10, %p41_p9  ;;  %p1585_p6 = por %p1806_p1, %p47_p11 }
  0x4a   : > { %p181_p13 = scmp.eq.s32.totalorder %s1486_s27, 1  ;;  %p187_p0 = scmp.eq.s32.totalorder %s965_s7, 1 }
  0x4b   : > { %s1818_s11 = scalar_select %p1585_p6, 1, 0 }
  0x4c   : > { %p1127_p2 = scmp.lt.s32.totalorder %s1417_s24, 2  ;;  %s1592_s12 = sand.u32 1, %s1413_s23  }
  0x4d   : > { %p1594_p5 = por %p181_p13, %p41_p9  ;;  %p1598_p8 = por %p187_p0, %p47_p11 }
  0x4e   : > { %s972_s18 = sshll.u32 %s1592_s12, 3  ;;  %s973_s19 = sshll.u32 %s1417_s24, 7 }
  0x4f   : > { %s1819_s16 = scalar_select %p1594_p5, 1, 0 }
  0x50   : > { %s1820_s17 = scalar_select %p1598_p8, 1, 0 }
  0x51   : > { %s1821_s0 = sld [smem:[#allocation20_spill]]  ;;  %s263_s29 = scalar_lea.vmem [#allocation2], %s972_s18 }
  0x52   : > { %s270_s30 = sshll.u32 %s263_s29, 4  ;;  %p1613_p7 = pnand %p1127_p2, %p1579_p12  ;;  %s1609_s30 = int_to_ptr.vmem [resolvable:$true] %s270_s30 }
  0x53   : > { %s260_s10 = scalar_lea.sflag [#allocation3], %s1592_s12 }
  0x54   : > { %p1283_p10 = pneg %p1613_p7 }
  0x57   : > { %s1607_s26 = scalar_lea.hbm %s1821_s0, %s973_s19  ;;  %s1286_s15 = scalar_lea.hbm %s1821_s0, 256 }
  0x58   : > { %s1281_s13 = scalar_lea.hbm %s1607_s26, 128  ;;  %p1287_p12 = scmp.lt.s32.totalorder %s1607_s26, %s1821_s0 }
  0x59   : > { %p1282_p9 = scmp.ne.s32.totalorder %s1607_s26, %s1281_s13  ;;  %p1288_p0 = scmp.lt.s32.totalorder %s1286_s15, %s1281_s13 }
  0x5b   : > { %p1284_p11 = pnand %p1283_p10, %p1282_p9  ;;  %p1289_p2 = por %p1288_p0, %p1287_p12 }
  0x5d   : > { %p1285_p13 = pneg %p1284_p11 }
  0x5f   : > { %p1290_p4 = pnand %p1289_p2, %p1285_p13 }
  0x61   : > { %1293 = shalt.err (!%p1290_p4)
}
  0x62   : > { %s1294_s29 = scalar_lea.vmem %s1609_s30, 128  ;;  %s1425_s18 = smov [#allocation2]  }
  0x63   : > { %p1295_p1 = scmp.ne.s32.totalorder %s1609_s30, %s1294_s29  ;;  %s1299_s19 = sshll.u32 %s1425_s18, 4  ;;  %s1300_s19 = int_to_ptr.vmem [resolvable:$false] %s1299_s19 }
  0x64   : > { %s1301_s7 = scalar_lea.vmem %s1300_s19, 256  ;;  %p1302_p8 = scmp.lt.s32.totalorder %s1609_s30, %s1300_s19 }
  0x65   : > { %p1297_p9 = pnand %p1295_p1, %p1283_p10  ;;  %p1303_p5 = scmp.lt.s32.totalorder %s1301_s7, %s1294_s29 }
  0x67   : > { %p1298_p11 = pneg %p1297_p9  ;;  %p1304_p6 = por %p1303_p5, %p1302_p8 }
  0x69   : > { %p1305_p12 = pnand %p1304_p6, %p1298_p11 }
  0x6b   : > { %1308 = shalt.err (!%p1305_p12)
}
  0x6c   : > { %1115 = dma.hbm_to_vmem [thread:$0]  (!%p1613_p7), %s1607_s26, 128, %s1609_s30, %s260_s10  }
  0x6d   : > { %s974_s13 = sshll.u32 %s1417_s24, 4  ;;  %s280_s15 = scalar_lea.vmem [#allocation5], %s1592_s12 }
  0x6e   : > { %s287_s20 = sshll.u32 %s280_s15, 4  ;;  %s285_s19 = scalar_lea.hbm %s1800_s1, %s974_s13  ;;  %s288_s20 = int_to_ptr.vmem [resolvable:$true] %s287_s20 }
  0x6f   : > { %s1823_s7 = sand.u32 1, %s1417_s24   ;;  %s1309_s0 = scalar_lea.hbm %s285_s19, 16 }
  0x70   : > { %s278_s29 = scalar_lea.sflag [#allocation6], %s1823_s7  ;;  %p1310_p1 = scmp.ne.s32.totalorder %s285_s19, %s1309_s0 }
  0x71   : > { %s1314_s26 = scalar_lea.hbm %s1800_s1, 32  ;;  %p1315_p5 = scmp.lt.s32.totalorder %s285_s19, %s1800_s1 }
  0x72   : > { %p1312_p4 = pnand %p1310_p1, %p1283_p10  ;;  %p1316_p8 = scmp.lt.s32.totalorder %s1314_s26, %s1309_s0 }
  0x74   : > { %p1313_p6 = pneg %p1312_p4  ;;  %p1317_p13 = por %p1316_p8, %p1315_p5 }
  0x76   : > { %p1318_p0 = pnand %p1317_p13, %p1313_p6 }
  0x78   : > { %1321 = shalt.err (!%p1318_p0)
}
  0x79   : > { %s1322_s10 = scalar_lea.vmem %s288_s20, 16  ;;  %s1426_s13 = smov [#allocation5]  }
  0x7a   : > { %p1323_p2 = scmp.ne.s32.totalorder %s288_s20, %s1322_s10  ;;  %s1327_s15 = sshll.u32 %s1426_s13, 4  ;;  %s1328_s15 = int_to_ptr.vmem [resolvable:$false] %s1327_s15 }
  0x7b   : > { %s1329_s2 = scalar_lea.vmem %s1328_s15, 32  ;;  %p1330_p12 = scmp.lt.s32.totalorder %s288_s20, %s1328_s15 }
  0x7c   : > { %p1325_p9 = pnand %p1323_p2, %p1283_p10  ;;  %p1331_p1 = scmp.lt.s32.totalorder %s1329_s2, %s1322_s10 }
  0x7e   : > { %p1326_p11 = pneg %p1325_p9  ;;  %p1332_p4 = por %p1331_p1, %p1330_p12 }
  0x80   : > { %p1333_p3 = pnand %p1332_p4, %p1326_p11 }
  0x82   : > { %1336 = shalt.err (!%p1333_p3)
}
  0x83   : > { %1118 = dma.hbm_to_vmem [thread:$0]  (!%p1613_p7), %s285_s19, 16, %s288_s20, %s278_s29  }
  0x84   : > { %p1824_p6 = scmp.ne.s32.totalorder %s1813_s28, 0 }
  0x85   : > { %s1667_s0 = sand.u32 (!%p1824_p6), 1, %s1409_s22   ;;  %p1825_p10 = scmp.ne.s32.totalorder (!%p1824_p6), %s1818_s11, 0 }
  0x86   : > { %296 = sbr.rel (%p1824_p6) target bundleno = 1225 (0x4c9), region = 44  ;;  %s976_s3 = sshll.u32 (!%p1824_p6), %s1667_s0, 3 }
  0x87   : > { %s299_s25 = scalar_lea.sflag (!%p1824_p6), [#allocation3], %s1667_s0  ;;  %s1671_s18 = scalar_lea.vmem (!%p1824_p6), [#allocation2], %s976_s3 }
  0x8b   : > { %1380 = dma.done.wait (%p1825_p10), %s299_s25, 128  }
  0x8c   : > { %1382 = vsyncadd (%p1825_p10), %s299_s25, 4294967168  ;;  %s307_s28 = sand.u32 1, %s1486_s27   ;;  %s310_s20 = scalar_lea.vmem [#allocation5], %s1667_s0 }
  0x8d   : > { %s308_s8 = scalar_lea.sflag [#allocation6], %s307_s28 }
  0x8e   : > { %1384 = dma.done.wait (%p1825_p10), %s308_s8, 16  }
  0x8f   : > { %1386 = vsyncadd (%p1825_p10), %s308_s8, 4294967280  ;;  %p1826_p3 = scmp.eq.s32.totalorder %s1486_s27, 0 }
  0x91   : > { %1388 = dma.done.wait (%p1826_p3), [#allocation6], 512   ;;  %p1827_p7 = pmov %p1826_p3 }
  0x92   : > { %p1828_p5 = pmov %p1826_p3 }
  0x93   : > { %1390 = vsyncadd (%p1827_p7), [#allocation6], 4294966784 }
  0x94   : > { %1392 = dma.done.wait (%p1828_p5), [#allocation9], 1024   ;;  %p1829_p8 = pmov %p1826_p3 }
  0x95   : > { %p1830_p13 = pmov %p1826_p3 }
  0x96   : > { %1394 = vsyncadd (%p1829_p8), [#allocation9], 4294966272 }
  0x97   : > { %1396 = dma.done.wait (%p1830_p13), [#allocation12], 512   ;;  %p1831_p0 = pmov %p1826_p3 }
  0x98   : > { %v1427_v0 = vmov 0.0   ;;  %vm1428_vm0 = vmmov 0   ;;  %vm363_vm1 = vcmask 261120   ;;  %v362_v1 = vld [vmem:[#allocation7 + $0x18] sm:$0xff]  ;;  %v361_v3 = vld [vmem:[#allocation7 + $0x10] sm:$0xff]  ;;  %v360_v5 = vld [vmem:[#allocation7 + $0x8] sm:$0xff]  ;;  %v625_v15 = vlaneseq }
  0x99   : > { %1398 = vsyncadd (%p1831_p0), [#allocation12], 4294966784  ;;  %1028 = vmatprep.subr.mxu0 %v1427_v0  ;;  %1039 = vmatprep.subr.mxu1 %v1427_v0  ;;  %v452_v2 = vld [vmem:[#allocation8 + $0x18] sm:$0xff]  ;;  %v451_v4 = vld [vmem:[#allocation8 + $0x10] sm:$0xff]  ;;  %vm706_vm2 = vcmask 64512   ;;  %s1003_s11 = sshll.u32 %s1486_s27, 4 }
  0x9a   : > { %1036 = vmatprep.mubr.msk.f32.mxu0 %vm1428_vm0, %v1427_v0  ;;  %1047 = vmatprep.mubr.msk.f32.mxu1 %vm1428_vm0, %v1427_v0  ;;  %v450_v6 = vld [vmem:[#allocation8 + $0x8] sm:$0xff]  ;;  %v359_v7 = vld [vmem:[#allocation7] sm:$0xff]  ;;  %v626_v16 = vshrl.u32 %v625_v15, 7  ;;  %v538_v25 = vld [vmem:[#allocation10 + $0x18] sm:$0xff]  ;;  %s357_s19 = scalar_lea.vmem [#allocation13], %s1667_s0  ;;  %vm826_vm3 = vcmask 253952   ;;  %s1756_s30 = scalar_lea.hbm %s1805_s6, %s1003_s11 }
  0x9b   : > { %1029 = vmatpush3.xpose.msk.msra.mxu0 %vm363_vm1, %v362_v1  ;;  %1040 = vmatpush3.xpose.msk.msra.mxu1 %vm363_vm1, %v452_v2  ;;  %v449_v8 = vld [vmem:[#allocation8] sm:$0xff]  ;;  %v358_v9 = vld [vmem:[%s1671_s18] sm:$0xff]  ;;  %s841_s7 = sshll.u32 %s357_s19, 4  ;;  %s829_s12 = scalar_lea.sflag [#allocation4], %s1667_s0  ;;  %s1758_s7 = int_to_ptr.vmem [resolvable:$true] %s841_s7 }
  0x9c   : > { %1030 = vmatprep.subr.mxu0 %v1427_v0  ;;  %1041 = vmatprep.subr.mxu1 %v1427_v0  ;;  %v622_v17 = vld [vmem:[%s310_s20] sm:$0x1]  ;;  %v627_v19 = vsub.s32 0, %v626_v16  ;;  %v537_v26 = vld [vmem:[#allocation10 + $0x10] sm:$0xff]  ;;  %v535_v28 = vld [vmem:[#allocation10] sm:$0xff]  ;;  %s1337_s10 = scalar_lea.vmem %s1758_s7, 16 }
  0x9d   : > { %v623_v18 = vmul.f32 -1e+30, %v622_v17  ;;  %v536_v27 = vld [vmem:[#allocation10 + $0x8] sm:$0xff]  ;;  %v740_v41 = vld [vmem:[#allocation11 + $0x18] sm:$0xff]  ;;  %v739_v44 = vld [vmem:[#allocation11 + $0x10] sm:$0xff]  ;;  %p1338_p2 = scmp.ne.s32.totalorder %s1758_s7, %s1337_s10  ;;  %p1832_p9 = scmp.ne.s32.totalorder %s1819_s16, 0 }
  0x9e   : > { %v738_v47 = vld [vmem:[#allocation11 + $0x8] sm:$0xff]  ;;  %v737_v50 = vld [vmem:[#allocation11] sm:$0xff]  ;;  %s1429_s27 = smov [#allocation13]  }
  0x9f   : > { %1031 = vmatpush3.xpose.msk.msra.mxu0 %vm363_vm1, %v361_v3  ;;  %1042 = vmatpush3.xpose.msk.msra.mxu1 %vm363_vm1, %v451_v4  ;;  %v628_v20 = vrot.slane %v623_v18, %v627_v19  ;;  %p1339_p11 = pnand %p1338_p2, %p1832_p9  ;;  %s1341_s13 = sshll.u32 %s1429_s27, 4  ;;  %s1342_s13 = int_to_ptr.vmem [resolvable:$false] %s1341_s13 }
  0xa0   : > { %1032 = vmatprep.subr.mxu0 %v1427_v0  ;;  %1043 = vmatprep.subr.mxu1 %v1427_v0  ;;  %s1343_s15 = scalar_lea.vmem %s1342_s13, 32  ;;  %p1344_p1 = scmp.lt.s32.totalorder %s1758_s7, %s1342_s13 }
  0xa1   : > { %p1340_p12 = pneg %p1339_p11  ;;  %p1345_p4 = scmp.lt.s32.totalorder %s1343_s15, %s1337_s10 }
  0xa3   : > { %1033 = vmatpush3.xpose.msk.msra.mxu0 %vm363_vm1, %v360_v5  ;;  %1044 = vmatpush3.xpose.msk.msra.mxu1 %vm363_vm1, %v450_v6  ;;  %p1346_p6 = por %p1345_p4, %p1344_p1 }
  0xa4   : > { %1034 = vmatprep.subr.mxu0 %v1427_v0  ;;  %1045 = vmatprep.subr.mxu1 %v1427_v0 }
  0xa5   : > { %p1347_p10 = pnand %p1346_p6, %p1340_p12 }
  0xa7   : > { %1035 = vmatpush3.xpose.msk.msra.mxu0 %vm363_vm1, %v359_v7  ;;  %1046 = vmatpush3.xpose.msk.msra.mxu1 %vm363_vm1, %v449_v8 }
  0xa8   : > { %1061 = vmatprep.subr.mxu1 %v1427_v0  ;;  %1050 = vmatprep.subr.mxu0 %v1427_v0 }
  0xaa   : > { %1037 = vmatmul.mubr.msk.f32.vlgmr.msra.gmra.mxu0 %vm363_vm1, %v358_v9  ;;  %1048 = vmatmul.mubr.msk.f32.vlgmr.msra.gmra.mxu1 %vm363_vm1, %v358_v9 }
  0xab   : > { %1063 = vmatprep.mubr.msk.f32.mxu1 %vm1428_vm0, %v1427_v0  ;;  %1058 = vmatprep.mubr.msk.f32.mxu0 %vm1428_vm0, %v1427_v0 }
  0xac   : > { %1051 = vmatpush3.xpose.msk.msra.mxu0 %vm363_vm1, %v538_v25 }
  0xad   : > { %1052 = vmatprep.subr.mxu0 %v1427_v0 }
  0xb0   : > { %1053 = vmatpush3.xpose.msk.msra.mxu0 %vm363_vm1, %v537_v26 }
  0xb1   : > { %1054 = vmatprep.subr.mxu0 %v1427_v0 }
  0xb4   : > { %1055 = vmatpush3.xpose.msk.msra.mxu0 %vm363_vm1, %v536_v27 }
  0xb5   : > { %1056 = vmatprep.subr.mxu0 %v1427_v0 }
  0xb8   : > { %1057 = vmatpush3.xpose.msk.msra.mxu0 %vm363_vm1, %v535_v28 }
  0xbb   : > { %1059 = vmatmul.mubr.msk.f32.vlgmr.msra.gmra.mxu0 %vm363_vm1, %v358_v9 }
 0x16a   : > { %v445_v10 = vpop.f32.mrf.mxu0  ;;  %v531_v11 = vpop.f32.mrf.mxu1 }
 0x16b   : > { %v621_v12 = vmul.f32 0.17677669, %v445_v10  ;;  %1062 = vmatpush3.xpose.msk.msra.mxu1 %vm363_vm1, %v531_v11 }
 0x16c   : > { %v1038_v13 = vpop.f32.mrf.mxu0  ;;  %v1049_v14 = vpop.f32.mrf.mxu1  ;;  %1066 = vmatprep.subr.mxu1 %v1427_v0 }
 0x16e   : > { %1064 = vmatmul.mubr.msk.f32.vlgmr.msra.gmra.mxu1 %vm363_vm1, %v621_v12 }
 0x16f   : > { %1074 = vmatprep.mubr.msk.f32.mxu1 %vm1428_vm0, %v1427_v0  ;;  %1067 = vmatpush3.xpose.msk.msra.mxu1 %vm363_vm1, %v740_v41 }
 0x170   : > { %1068 = vmatprep.subr.mxu1 %v1427_v0 }
 0x173   : > { %1069 = vmatpush3.xpose.msk.msra.mxu1 %vm363_vm1, %v739_v44 }
 0x174   : > { %1070 = vmatprep.subr.mxu1 %v1427_v0 }
 0x177   : > { %1071 = vmatpush3.xpose.msk.msra.mxu1 %vm363_vm1, %v738_v47 }
 0x178   : > { %1072 = vmatprep.subr.mxu1 %v1427_v0 }
 0x17b   : > { %v617_v34 = vpop.f32.mrf.mxu0  ;;  %1073 = vmatpush3.xpose.msk.msra.mxu1 %vm363_vm1, %v737_v50 }
 0x17d   : > { %v1060_v35 = vpop.f32.mrf.mxu0 }
 0x22e   : > { %v702_v21 = vpop.f32.mrf.mxu1 }
 0x22f   : > { %v703_v22 = vadd.f32 %v702_v21, %v628_v20 }
 0x230   : > { %v1065_v23 = vpop.f32.mrf.mxu1 }
 0x231   : > { %v707_v24 = vsel %vm706_vm2, %v703_v22, -inf }
 0x232   : > { %708 = vmax.xlane.f32.xlu0 %v707_v24 }
 0x2bb   : > { %v709_v29 = vpop.xlane.xlu0 %708 }
 0x2bc   : > { %v710_v30 = vsub.f32 %v703_v22, %v709_v29 }
 0x2be   : > { %v711_v31 = vmul.f32 1.442695, %v710_v30 }
 0x2c0   : > { %1173 = vpow2.f32 %v711_v31 }
 0x2cd   : > { %v1174_v32 = vpop.eup %1173 }
 0x2ce   : > { %v713_v33 = vsel %vm706_vm2, %v1174_v32, 0.0 }
 0x2cf   : > { %714 = vadd.xlane.f32.xlu0 %v713_v33 }
 0x358   : > { %v715_v36 = vpop.xlane.xlu0 %714 }
 0x359   : > { %1175 = vrcp.f32 %v715_v36 }
 0x366   : > { %v1176_v37 = vpop.eup %1175 }
 0x367   : > { %v717_v38 = vmul.f32 %v1176_v37, %v1174_v32 }
 0x369   : > { %v718_v39 = vsel %vm706_vm2, %v717_v38, 0.0 }
 0x36a   : > { %v719_v40 = vrot.slane %v718_v39, 4 }
 0x36c   : > { %v720_v42 = vadd.f32 %v719_v40, %v718_v39 }
 0x36e   : > { %v721_v43 = vrot.slane %v720_v42, 2 }
 0x370   : > { %v722_v45 = vadd.f32 %v721_v43, %v720_v42 }
 0x372   : > { %v723_v46 = vrot.slane %v722_v45, 1 }
 0x374   : > { %v724_v48 = vadd.f32 %v723_v46, %v722_v45 }
 0x376   : > { %v725_v49 = vmul.f32 0.125, %v724_v48 }
 0x378   : > { %727 = vbcast.lane.b32.xlu1 %v725_v49, 256 }
 0x3ea   : > { %v728_v51 = vpop.permute.xlu1 %727 }
 0x3eb   : > { %v729_v52 = vmul.f32 %v728_v51, %v617_v34 }
 0x3ed   : > { %v730_v53 = vsel %vm363_vm1, %v729_v52, 0.0 }
 0x3ee   : > { %v731_v54 = vrot.slane %v730_v53, 4 }
 0x3f0   : > { %v732_v55 = vadd.f32 %v731_v54, %v730_v53 }
 0x3f2   : > { %v733_v56 = vrot.slane %v732_v55, 2 }
 0x3f4   : > { %v734_v57 = vadd.f32 %v733_v56, %v732_v55 }
 0x3f6   : > { %v735_v58 = vrot.slane %v734_v57, 1 }
 0x3f8   : > { %v736_v59 = vadd.f32 %v735_v58, %v734_v57 }
 0x3fa   : > { %1075 = vmatmul.mubr.msk.f32.vlgmr.msra.gmra.mxu1 %vm363_vm1, %v736_v59 }
 0x4ba   : > { %v822_v60 = vpop.f32.mrf.mxu1 }
 0x4bb   : > { %827 = vst.msk [vmem:[%s357_s19] sm:$0x1] %vm826_vm3, %v822_v60 }
 0x4bc   : > { %v1076_v61 = vpop.f32.mrf.mxu1 }
 0x4bd   : > { %1350 = shalt.err (!%p1347_p10)
}
 0x4be   : > { %s1351_s2 = scalar_lea.hbm %s1756_s30, 16  ;;  %s1355_s25 = scalar_lea.hbm %s1805_s6, 32 }
 0x4bf   : > { %p1352_p3 = scmp.ne.s32.totalorder %s1756_s30, %s1351_s2  ;;  %p1356_p8 = scmp.lt.s32.totalorder %s1756_s30, %s1805_s6 }
 0x4c0   : > { %p1357_p13 = scmp.lt.s32.totalorder %s1355_s25, %s1351_s2 }
 0x4c1   : > { %p1353_p7 = pnand %p1352_p3, %p1832_p9 }
 0x4c2   : > { %p1358_p0 = por %p1357_p13, %p1356_p8 }
 0x4c3   : > { %p1354_p5 = pneg %p1353_p7 }
 0x4c5   : > { %p1359_p2 = pnand %p1358_p0, %p1354_p5 }
 0x4c7   : > { %1362 = shalt.err (!%p1359_p2)
}
 0x4c8   : > { %1097 = dma.vmem_to_hbm [thread:$0]  (%p1832_p9), %s1758_s7, 16, %s1756_s30, %s829_s12  }
 0x4c9 PF: > { %s853_s8 = sand.u32 1, %s1405_s21   ;;  %p1833_p11 = scmp.ne.s32.totalorder %s1820_s17, 0 }
 0x4ca   : > { %p1834_p12 = scmp.ge.s32.totalorder %s1417_s24, 2  ;;  %s854_s20 = scalar_lea.sflag [#allocation4], %s853_s8 }
 0x4cc   : > { %p1120_p1 = pnand %p1834_p12, %p1833_p11 }
 0x4ce   : > { %p1121_p4 = pneg %p1120_p1 }
 0x4d0   : > { %1400 = dma.done.wait (%p1121_p4), %s854_s20, 16  }
 0x4d1   : > { %1402 = vsyncadd (%p1121_p4), %s854_s20, 4294967280  ;;  %p24_p6 = scmp.ge.s32.totalorder %s1566_s9, 4   ;;  %s1835_s21 = smov %s1409_s22 }
 0x4d2   : > { %s1836_s22 = smov %s1413_s23  ;;  %s1837_s23 = smov %s1577_s14 }
 0x4d3   : > { %s1838_s24 = smov %s1566_s9  ;;  %26 = sbr.rel (!%p24_p6) target bundleno = 13 (0xd), region = 118 }
 0x4d8   :  { %858 = vsyncpa [#allocation3], 1 }
 0x4d9   :  { %860 = vsyncpa [#allocation3 + $0x1], 1 }
 0x4da   :  { %861 = vsyncpa [#allocation6], 1 }
 0x4db   :  { %863 = vsyncpa [#allocation6 + $0x1], 1 }
 0x4dc   :  { %864 = vsyncpa [#allocation9], 1 }
 0x4dd   :  { %865 = vsyncpa [#allocation12], 1 }
 0x4de   :  { %866 = vsyncpa [#allocation4], 1 }
 0x4df   :  { %868 = vsyncpa [#allocation4 + $0x1], 1 }

</bundles_post_ra>
